<compile_context>
chip_gen: v6e
topology: v6e:2x2x1
jax: 0.10.0
libtpu: 0.0.40
codegen_flags: <defaults>
</compile_context>

<pallas_src>
import functools

import jax
import jax.numpy as jnp
from jax.experimental import pallas as pl
from jax.experimental.pallas import tpu as pltpu


def _round_up(v, m):
    return (v + m - 1) // m * m


def _conv_block_kernel(x_ref, w_ref, mask_ref, gb_ref, o_ref, *,
                       tap_offsets, out_len, n_images, count, eps):
    # x_ref:    (N, Cin_p, L)         bf16  margin-padded flattened padded images
    # w_ref:    (Cout_p, K*Cin_p)     bf16  folded-K weight matrix (resident)
    # mask_ref: (N*out_len, 1)        f32   1.0 on valid (interior) spatial lanes
    # gb_ref:   (Cout_p, 2)           f32   col 0 = gamma, col 1 = beta
    # o_ref:    (N, Cout_p, out_len)  f32   BN+LeakyReLU output on the padded grid

    # Build the (K*Cin_p, N*out_len) bf16 patch with static lane-offset slices.
    # Lane concat offsets are multiples of out_len (multiple of 128) and sublane
    # concat offsets are multiples of Cin_p (multiple of 16) -> fully tile aligned.
    taps = []
    for off in tap_offsets:
        taps.append(jnp.concatenate(
            [x_ref[n, :, off:off + out_len] for n in range(n_images)], axis=1))
    patch = jnp.concatenate(taps, axis=0)                 # (K*Cin_p, N*out_len) bf16

    # Conv: single folded-K MXU contraction over the whole batch.
    y = jnp.dot(w_ref[...], patch,
                preferred_element_type=jnp.float32)       # (Cout_p, N*out_len) f32

    # BN batch statistics on the MXU: the mask column both selects valid lanes
    # and performs the cross-lane reduction.
    m = mask_ref[...]                                     # (N*out_len, 1) f32
    s1 = jnp.dot(y, m, preferred_element_type=jnp.float32)       # (Cout_p, 1) sum
    s2 = jnp.dot(y * y, m, preferred_element_type=jnp.float32)   # (Cout_p, 1) sum sq

    inv_n = 1.0 / count
    mean = s1 * inv_n
    # NOTE: E[y^2] - E[y]^2 is cancellation-prone when |mean| >> std; fine at this
    # scale/tolerance (conv outputs are near zero-mean here).
    var = s2 * inv_n - mean * mean                        # biased variance
    gamma = gb_ref[:, 0:1]
    beta = gb_ref[:, 1:2]
    scale = gamma * jax.lax.rsqrt(var + eps)              # (Cout_p, 1)
    shift = beta - mean * scale

    z = y * scale + shift                                 # lane-broadcast BN affine
    z = jnp.where(z >= 0, z, 0.1 * z)                     # LeakyReLU(0.1)
    for n in range(n_images):                             # lane-aligned full stores
        o_ref[n] = z[:, n * out_len:(n + 1) * out_len]


@jax.jit
def conv_block_forward(x_nchw, w_oihw, gamma, beta, eps=1e-5):
    N, Cin, H, W = x_nchw.shape
    Cout, _, KH, KW = w_oihw.shape
    ph, pw = KH // 2, KW // 2                  # 'same' conv, stride 1
    K = KH * KW
    Hp, Wp = H + 2 * ph, W + 2 * pw            # padded spatial extent
    P = Hp * Wp                                # flattened padded spatial size
    P_out = _round_up(P, 128)                  # lane-dense per-image length
    NP = N * P_out
    Cin_p = _round_up(Cin, 16)                 # bf16 sublane-tile aligned channels
    Cout_p = _round_up(Cout, 8)
    G = ph * Wp + pw                           # max |tap shift| on the flat axis
    L = P_out + 2 * G                          # margin so every tap slice is in-bounds
    tap_offsets = tuple(
        G + (kh - ph) * Wp + (kw - pw) for kh in range(KH) for kw in range(KW)
    )

    # --- layout glue (NCHW already has spatial last -> no transposes) -----------
    x = jnp.pad(x_nchw.astype(jnp.bfloat16),
                ((0, 0), (0, Cin_p - Cin), (ph, ph), (pw, pw)))    # (N, Cin_p, Hp, Wp)
    x_flat = jnp.pad(x.reshape(N, Cin_p, P), ((0, 0), (0, 0), (G, L - P - G)))

    w = jnp.pad(w_oihw.astype(jnp.bfloat16),
                ((0, Cout_p - Cout), (0, Cin_p - Cin), (0, 0), (0, 0)))
    w2 = jnp.transpose(w, (0, 2, 3, 1)).reshape(Cout_p, K * Cin_p)  # (Cout_p, K*Cin_p)

    r_idx = jnp.arange(P_out) // Wp
    c_idx = jnp.arange(P_out) % Wp
    valid = (r_idx >= ph) & (r_idx < ph + H) & (c_idx >= pw) & (c_idx < pw + W)
    mask_col = jnp.tile(valid.astype(jnp.float32), N).reshape(NP, 1)

    gamma_p = jnp.pad(gamma.astype(jnp.float32), (0, Cout_p - Cout), constant_values=1.0)
    beta_p = jnp.pad(beta.astype(jnp.float32), (0, Cout_p - Cout))
    gb = jnp.stack([gamma_p, beta_p], axis=1)             # (Cout_p, 2)

    # --- single fused kernel: conv + BN stats + BN affine + LeakyReLU -----------
    kernel = functools.partial(_conv_block_kernel,
                               tap_offsets=tap_offsets, out_len=P_out,
                               n_images=N, count=float(N * H * W), eps=float(eps))
    out_flat = pl.pallas_call(
        kernel,
        out_shape=jax.ShapeDtypeStruct((N, Cout_p, P_out), jnp.float32),
        grid_spec=pltpu.PrefetchScalarGridSpec(
            num_scalar_prefetch=0,
            grid=(1,),
            in_specs=[
                pl.BlockSpec((N, Cin_p, L), lambda i: (0, 0, 0)),
                pl.BlockSpec((Cout_p, K * Cin_p), lambda i: (0, 0)),
                pl.BlockSpec((NP, 1), lambda i: (0, 0)),
                pl.BlockSpec((Cout_p, 2), lambda i: (0, 0)),
            ],
            out_specs=pl.BlockSpec((N, Cout_p, P_out), lambda i: (0, 0, 0)),
        ),
        compiler_params=pltpu.CompilerParams(dimension_semantics=("arbitrary",)),
    )(x_flat, w2, mask_col, gb)
    # TODO(synk): for large N*H*W*C (batch no longer VMEM-resident) reintroduce a
    # two-pass structure with a spatial-tiling grid axis (bf16 intermediate y,
    # ph-row halo tiles, 512+ lanes/tile, vmem_limit_bytes sized per generation:
    # <=64 MiB on v7x, <=128 MiB on v5e/v6e) and keep N 'parallel' for v7x megacore.

    # --- extract the valid interior; result is already NCHW ---------------------
    out = out_flat[:, :Cout, :P].reshape(N, Cout, Hp, Wp)[:, :, ph:ph + H, pw:pw + W]
    return out


def _reference(x_nchw, w_oihw, gamma, beta, eps=1e-5):
    # Applies the same bf16 rounding to the conv operands as the kernel (MXU runs
    # bf16 with f32 accumulation); all downstream math is f32.
    x = x_nchw.astype(jnp.bfloat16).astype(jnp.float32)
    w = w_oihw.astype(jnp.bfloat16).astype(jnp.float32)
    y = jax.lax.conv_general_dilated(
        x, w, window_strides=(1, 1), padding=((1, 1), (1, 1)),
        dimension_numbers=("NCHW", "OIHW", "NCHW"))
    mean = y.mean(axis=(0, 2, 3), keepdims=True)
    var = y.var(axis=(0, 2, 3), keepdims=True)   # biased (PyTorch BN training norm)
    yn = (y - mean) / jnp.sqrt(var + eps)
    yn = yn * gamma.reshape(1, -1, 1, 1) + beta.reshape(1, -1, 1, 1)
    return jnp.where(yn >= 0, yn, 0.1 * yn)


if __name__ == "__main__":
    # ConvBlock(in_chanels=4, out_channels=8, kernel_size=3, padding=1)
    N, Cin, H, W = 2, 4, 16, 16
    Cout, KH, KW = 8, 3, 3

    key = jax.random.PRNGKey(0)
    kx, kw, kg, kb = jax.random.split(key, 4)
    x = jax.random.normal(kx, (N, Cin, H, W), dtype=jnp.float32)
    conv_w = 0.1 * jax.random.normal(kw, (Cout, Cin, KH, KW), dtype=jnp.float32)
    gamma = jax.random.uniform(kg, (Cout,), jnp.float32, 0.5, 1.5)   # BN weight
    beta = 0.1 * jax.random.normal(kb, (Cout,), dtype=jnp.float32)   # BN bias
    # TODO(synk): BatchNorm running-stat (momentum) buffer updates are a training
    # side effect that does not influence the forward output and is not modeled.

    out = jax.block_until_ready(conv_block_forward(x, conv_w, gamma, beta))
    ref = _reference(x, conv_w, gamma, beta)

    assert out.shape == (N, Cout, H, W), out.shape
    err = float(jnp.max(jnp.abs(out - ref)))
    assert jnp.allclose(out, ref, atol=2e-3, rtol=2e-3), err
    print("KERNEL_OK")
</pallas_src>

<mosaic_0001>
module attributes {stable_mosaic.version = 11 : i64} {
  func.func @_conv_block_kernel(%arg0: i32, %arg1: memref<2x16x422xbf16, #tpu.memory_space<vmem>>, %arg2: memref<8x144xbf16, #tpu.memory_space<vmem>>, %arg3: memref<768x1xf32, #tpu.memory_space<vmem>>, %arg4: memref<8x2xf32, #tpu.memory_space<vmem>>, %arg5: memref<2x8x384xf32, #tpu.memory_space<vmem>>) attributes {dimension_semantics = [#tpu.dimension_semantics<arbitrary>], iteration_bounds = array<i64: 1>, scalar_prefetch = 0 : i64, scratch_operands = 0 : i64, tpu.core_type = #tpu.core_type<tc>, window_params = [{pipeline_mode = #tpu.pipeline_mode<synchronous>, transform_indices = @transform_0, window_bounds = array<i64: 2, 16, 422>}, {pipeline_mode = #tpu.pipeline_mode<synchronous>, transform_indices = @transform_1, window_bounds = array<i64: 8, 144>}, {pipeline_mode = #tpu.pipeline_mode<synchronous>, transform_indices = @transform_2, window_bounds = array<i64: 768, 1>}, {pipeline_mode = #tpu.pipeline_mode<synchronous>, transform_indices = @transform_3, window_bounds = array<i64: 8, 2>}, {pipeline_mode = #tpu.pipeline_mode<synchronous>, transform_indices = @transform_4, window_bounds = array<i64: 2, 8, 384>}]} {
    %c0 = arith.constant 0 : index
    %c0_0 = arith.constant 0 : index
    %c0_1 = arith.constant 0 : index
    %0 = vector.load %arg1[%c0, %c0_0, %c0_1] : memref<2x16x422xbf16, #tpu.memory_space<vmem>>, vector<1x16x384xbf16>
    %1 = vector.shape_cast %0 : vector<1x16x384xbf16> to vector<16x384xbf16>
    %c1 = arith.constant 1 : index
    %c0_2 = arith.constant 0 : index
    %c0_3 = arith.constant 0 : index
    %2 = vector.load %arg1[%c1, %c0_2, %c0_3] : memref<2x16x422xbf16, #tpu.memory_space<vmem>>, vector<1x16x384xbf16>
    %3 = vector.shape_cast %2 : vector<1x16x384xbf16> to vector<16x384xbf16>
    %4 = tpu.concatenate %1, %3 in 1 : vector<16x384xbf16>, vector<16x384xbf16> -> vector<16x768xbf16>
    %c0_4 = arith.constant 0 : index
    %c0_5 = arith.constant 0 : index
    %c1_6 = arith.constant 1 : index
    %5 = vector.load %arg1[%c0_4, %c0_5, %c1_6] : memref<2x16x422xbf16, #tpu.memory_space<vmem>>, vector<1x16x384xbf16>
    %6 = vector.shape_cast %5 : vector<1x16x384xbf16> to vector<16x384xbf16>
    %c1_7 = arith.constant 1 : index
    %c0_8 = arith.constant 0 : index
    %c1_9 = arith.constant 1 : index
    %7 = vector.load %arg1[%c1_7, %c0_8, %c1_9] : memref<2x16x422xbf16, #tpu.memory_space<vmem>>, vector<1x16x384xbf16>
    %8 = vector.shape_cast %7 : vector<1x16x384xbf16> to vector<16x384xbf16>
    %9 = tpu.concatenate %6, %8 in 1 : vector<16x384xbf16>, vector<16x384xbf16> -> vector<16x768xbf16>
    %c0_10 = arith.constant 0 : index
    %c0_11 = arith.constant 0 : index
    %c2 = arith.constant 2 : index
    %10 = vector.load %arg1[%c0_10, %c0_11, %c2] : memref<2x16x422xbf16, #tpu.memory_space<vmem>>, vector<1x16x384xbf16>
    %11 = vector.shape_cast %10 : vector<1x16x384xbf16> to vector<16x384xbf16>
    %c1_12 = arith.constant 1 : index
    %c0_13 = arith.constant 0 : index
    %c2_14 = arith.constant 2 : index
    %12 = vector.load %arg1[%c1_12, %c0_13, %c2_14] : memref<2x16x422xbf16, #tpu.memory_space<vmem>>, vector<1x16x384xbf16>
    %13 = vector.shape_cast %12 : vector<1x16x384xbf16> to vector<16x384xbf16>
    %14 = tpu.concatenate %11, %13 in 1 : vector<16x384xbf16>, vector<16x384xbf16> -> vector<16x768xbf16>
    %c0_15 = arith.constant 0 : index
    %c0_16 = arith.constant 0 : index
    %c18 = arith.constant 18 : index
    %15 = vector.load %arg1[%c0_15, %c0_16, %c18] : memref<2x16x422xbf16, #tpu.memory_space<vmem>>, vector<1x16x384xbf16>
    %16 = vector.shape_cast %15 : vector<1x16x384xbf16> to vector<16x384xbf16>
    %c1_17 = arith.constant 1 : index
    %c0_18 = arith.constant 0 : index
    %c18_19 = arith.constant 18 : index
    %17 = vector.load %arg1[%c1_17, %c0_18, %c18_19] : memref<2x16x422xbf16, #tpu.memory_space<vmem>>, vector<1x16x384xbf16>
    %18 = vector.shape_cast %17 : vector<1x16x384xbf16> to vector<16x384xbf16>
    %19 = tpu.concatenate %16, %18 in 1 : vector<16x384xbf16>, vector<16x384xbf16> -> vector<16x768xbf16>
    %c0_20 = arith.constant 0 : index
    %c0_21 = arith.constant 0 : index
    %c19 = arith.constant 19 : index
    %20 = vector.load %arg1[%c0_20, %c0_21, %c19] : memref<2x16x422xbf16, #tpu.memory_space<vmem>>, vector<1x16x384xbf16>
    %21 = vector.shape_cast %20 : vector<1x16x384xbf16> to vector<16x384xbf16>
    %c1_22 = arith.constant 1 : index
    %c0_23 = arith.constant 0 : index
    %c19_24 = arith.constant 19 : index
    %22 = vector.load %arg1[%c1_22, %c0_23, %c19_24] : memref<2x16x422xbf16, #tpu.memory_space<vmem>>, vector<1x16x384xbf16>
    %23 = vector.shape_cast %22 : vector<1x16x384xbf16> to vector<16x384xbf16>
    %24 = tpu.concatenate %21, %23 in 1 : vector<16x384xbf16>, vector<16x384xbf16> -> vector<16x768xbf16>
    %c0_25 = arith.constant 0 : index
    %c0_26 = arith.constant 0 : index
    %c20 = arith.constant 20 : index
    %25 = vector.load %arg1[%c0_25, %c0_26, %c20] : memref<2x16x422xbf16, #tpu.memory_space<vmem>>, vector<1x16x384xbf16>
    %26 = vector.shape_cast %25 : vector<1x16x384xbf16> to vector<16x384xbf16>
    %c1_27 = arith.constant 1 : index
    %c0_28 = arith.constant 0 : index
    %c20_29 = arith.constant 20 : index
    %27 = vector.load %arg1[%c1_27, %c0_28, %c20_29] : memref<2x16x422xbf16, #tpu.memory_space<vmem>>, vector<1x16x384xbf16>
    %28 = vector.shape_cast %27 : vector<1x16x384xbf16> to vector<16x384xbf16>
    %29 = tpu.concatenate %26, %28 in 1 : vector<16x384xbf16>, vector<16x384xbf16> -> vector<16x768xbf16>
    %c0_30 = arith.constant 0 : index
    %c0_31 = arith.constant 0 : index
    %c36 = arith.constant 36 : index
    %30 = vector.load %arg1[%c0_30, %c0_31, %c36] : memref<2x16x422xbf16, #tpu.memory_space<vmem>>, vector<1x16x384xbf16>
    %31 = vector.shape_cast %30 : vector<1x16x384xbf16> to vector<16x384xbf16>
    %c1_32 = arith.constant 1 : index
    %c0_33 = arith.constant 0 : index
    %c36_34 = arith.constant 36 : index
    %32 = vector.load %arg1[%c1_32, %c0_33, %c36_34] : memref<2x16x422xbf16, #tpu.memory_space<vmem>>, vector<1x16x384xbf16>
    %33 = vector.shape_cast %32 : vector<1x16x384xbf16> to vector<16x384xbf16>
    %34 = tpu.concatenate %31, %33 in 1 : vector<16x384xbf16>, vector<16x384xbf16> -> vector<16x768xbf16>
    %c0_35 = arith.constant 0 : index
    %c0_36 = arith.constant 0 : index
    %c37 = arith.constant 37 : index
    %35 = vector.load %arg1[%c0_35, %c0_36, %c37] : memref<2x16x422xbf16, #tpu.memory_space<vmem>>, vector<1x16x384xbf16>
    %36 = vector.shape_cast %35 : vector<1x16x384xbf16> to vector<16x384xbf16>
    %c1_37 = arith.constant 1 : index
    %c0_38 = arith.constant 0 : index
    %c37_39 = arith.constant 37 : index
    %37 = vector.load %arg1[%c1_37, %c0_38, %c37_39] : memref<2x16x422xbf16, #tpu.memory_space<vmem>>, vector<1x16x384xbf16>
    %38 = vector.shape_cast %37 : vector<1x16x384xbf16> to vector<16x384xbf16>
    %39 = tpu.concatenate %36, %38 in 1 : vector<16x384xbf16>, vector<16x384xbf16> -> vector<16x768xbf16>
    %c0_40 = arith.constant 0 : index
    %c0_41 = arith.constant 0 : index
    %c38 = arith.constant 38 : index
    %40 = vector.load %arg1[%c0_40, %c0_41, %c38] : memref<2x16x422xbf16, #tpu.memory_space<vmem>>, vector<1x16x384xbf16>
    %41 = vector.shape_cast %40 : vector<1x16x384xbf16> to vector<16x384xbf16>
    %c1_42 = arith.constant 1 : index
    %c0_43 = arith.constant 0 : index
    %c38_44 = arith.constant 38 : index
    %42 = vector.load %arg1[%c1_42, %c0_43, %c38_44] : memref<2x16x422xbf16, #tpu.memory_space<vmem>>, vector<1x16x384xbf16>
    %43 = vector.shape_cast %42 : vector<1x16x384xbf16> to vector<16x384xbf16>
    %44 = tpu.concatenate %41, %43 in 1 : vector<16x384xbf16>, vector<16x384xbf16> -> vector<16x768xbf16>
    %45 = tpu.concatenate %4, %9, %14, %19, %24, %29, %34, %39, %44 in 0 : vector<16x768xbf16>, vector<16x768xbf16>, vector<16x768xbf16>, vector<16x768xbf16>, vector<16x768xbf16>, vector<16x768xbf16>, vector<16x768xbf16>, vector<16x768xbf16>, vector<16x768xbf16> -> vector<144x768xbf16>
    %c0_45 = arith.constant 0 : index
    %c0_46 = arith.constant 0 : index
    %46 = vector.load %arg2[%c0_45, %c0_46] : memref<8x144xbf16, #tpu.memory_space<vmem>>, vector<8x144xbf16>
    %cst = arith.constant dense<0.000000e+00> : vector<8x768xf32>
    %47 = tpu.matmul %46, %45, %cst {dimension_numbers = #tpu.dot_dimension_numbers<[1], [0], [0], [1], [0, 0, 1, 1], [], []>} : vector<8x144xbf16>, vector<144x768xbf16>, vector<8x768xf32> -> vector<8x768xf32>
    %c0_47 = arith.constant 0 : index
    %c0_48 = arith.constant 0 : index
    %48 = vector.load %arg3[%c0_47, %c0_48] : memref<768x1xf32, #tpu.memory_space<vmem>>, vector<768x1xf32>
    %cst_49 = arith.constant dense<0.000000e+00> : vector<8x1xf32>
    %49 = tpu.matmul %47, %48, %cst_49 {dimension_numbers = #tpu.dot_dimension_numbers<[1], [0], [0], [1], [0, 0, 1, 1], [], []>} : vector<8x768xf32>, vector<768x1xf32>, vector<8x1xf32> -> vector<8x1xf32>
    %50 = arith.mulf %47, %47 : vector<8x768xf32>
    %cst_50 = arith.constant dense<0.000000e+00> : vector<8x1xf32>
    %51 = tpu.matmul %50, %48, %cst_50 {dimension_numbers = #tpu.dot_dimension_numbers<[1], [0], [0], [1], [0, 0, 1, 1], [], []>} : vector<8x768xf32>, vector<768x1xf32>, vector<8x1xf32> -> vector<8x1xf32>
    %cst_51 = arith.constant 0.001953125 : f32
    %52 = vector.broadcast %cst_51 : f32 to vector<8x1xf32>
    %53 = arith.mulf %49, %52 : vector<8x1xf32>
    %cst_52 = arith.constant 0.001953125 : f32
    %54 = vector.broadcast %cst_52 : f32 to vector<8x1xf32>
    %55 = arith.mulf %51, %54 : vector<8x1xf32>
    %56 = arith.mulf %53, %53 : vector<8x1xf32>
    %57 = arith.subf %55, %56 : vector<8x1xf32>
    %c0_53 = arith.constant 0 : index
    %c0_54 = arith.constant 0 : index
    %58 = vector.load %arg4[%c0_53, %c0_54] : memref<8x2xf32, #tpu.memory_space<vmem>>, vector<8x1xf32>
    %c0_55 = arith.constant 0 : index
    %c1_56 = arith.constant 1 : index
    %59 = vector.load %arg4[%c0_55, %c1_56] : memref<8x2xf32, #tpu.memory_space<vmem>>, vector<8x1xf32>
    %cst_57 = arith.constant 9.99999974E-6 : f32
    %60 = vector.broadcast %cst_57 : f32 to vector<8x1xf32>
    %61 = arith.addf %57, %60 : vector<8x1xf32>
    %62 = math.rsqrt %61 : vector<8x1xf32>
    %63 = arith.mulf %58, %62 : vector<8x1xf32>
    %64 = arith.mulf %53, %63 : vector<8x1xf32>
    %65 = arith.subf %59, %64 : vector<8x1xf32>
    %66 = vector.broadcast %63 : vector<8x1xf32> to vector<8x768xf32>
    %67 = arith.mulf %47, %66 : vector<8x768xf32>
    %68 = vector.broadcast %65 : vector<8x1xf32> to vector<8x768xf32>
    %69 = arith.addf %67, %68 : vector<8x768xf32>
    %cst_58 = arith.constant 0.000000e+00 : f32
    %70 = vector.broadcast %cst_58 : f32 to vector<8x768xf32>
    %71 = arith.cmpf oge, %69, %70 : vector<8x768xf32>
    %cst_59 = arith.constant 1.000000e-01 : f32
    %72 = vector.broadcast %cst_59 : f32 to vector<8x768xf32>
    %73 = arith.mulf %72, %69 : vector<8x768xf32>
    %74 = arith.select %71, %69, %73 : vector<8x768xi1>, vector<8x768xf32>
    %75 = vector.extract_strided_slice %74 {offsets = [0, 0], sizes = [8, 384], strides = [1, 1]} : vector<8x768xf32> to vector<8x384xf32>
    %c0_60 = arith.constant 0 : index
    %c0_61 = arith.constant 0 : index
    %c0_62 = arith.constant 0 : index
    %76 = vector.load %arg5[%c0_60, %c0_61, %c0_62] : memref<2x8x384xf32, #tpu.memory_space<vmem>>, vector<1x8x384xf32>
    %77 = vector.shape_cast %76 : vector<1x8x384xf32> to vector<8x384xf32>
    %78 = vector.shape_cast %75 : vector<8x384xf32> to vector<1x8x384xf32>
    tpu.vector_store %arg5[%c0_60, %c0_61, %c0_62], %78 {strides = array<i32>} : memref<2x8x384xf32, #tpu.memory_space<vmem>>, vector<1x8x384xf32>,
    %79 = vector.extract_strided_slice %74 {offsets = [0, 384], sizes = [8, 384], strides = [1, 1]} : vector<8x768xf32> to vector<8x384xf32>
    %c1_63 = arith.constant 1 : index
    %c0_64 = arith.constant 0 : index
    %c0_65 = arith.constant 0 : index
    %80 = vector.load %arg5[%c1_63, %c0_64, %c0_65] : memref<2x8x384xf32, #tpu.memory_space<vmem>>, vector<1x8x384xf32>
    %81 = vector.shape_cast %80 : vector<1x8x384xf32> to vector<8x384xf32>
    %82 = vector.shape_cast %79 : vector<8x384xf32> to vector<1x8x384xf32>
    tpu.vector_store %arg5[%c1_63, %c0_64, %c0_65], %82 {strides = array<i32>} : memref<2x8x384xf32, #tpu.memory_space<vmem>>, vector<1x8x384xf32>,
    return
  }
  func.func @transform_0(%arg0: i32) -> (i32, i32, i32) {
    %c0_i32 = arith.constant 0 : i32
    %c0_i32_0 = arith.constant 0 : i32
    %c0_i32_1 = arith.constant 0 : i32
    %c0_i32_2 = arith.constant 0 : i32
    return %c0_i32, %c0_i32_0, %c0_i32_1 : i32, i32, i32
  }
  func.func @transform_1(%arg0: i32) -> (i32, i32) {
    %c0_i32 = arith.constant 0 : i32
    %c0_i32_0 = arith.constant 0 : i32
    %c0_i32_1 = arith.constant 0 : i32
    return %c0_i32, %c0_i32_0 : i32, i32
  }
  func.func @transform_2(%arg0: i32) -> (i32, i32) {
    %c0_i32 = arith.constant 0 : i32
    %c0_i32_0 = arith.constant 0 : i32
    %c0_i32_1 = arith.constant 0 : i32
    return %c0_i32, %c0_i32_0 : i32, i32
  }
  func.func @transform_3(%arg0: i32) -> (i32, i32) {
    %c0_i32 = arith.constant 0 : i32
    %c0_i32_0 = arith.constant 0 : i32
    %c0_i32_1 = arith.constant 0 : i32
    return %c0_i32, %c0_i32_0 : i32, i32
  }
  func.func @transform_4(%arg0: i32) -> (i32, i32, i32) {
    %c0_i32 = arith.constant 0 : i32
    %c0_i32_0 = arith.constant 0 : i32
    %c0_i32_1 = arith.constant 0 : i32
    %c0_i32_2 = arith.constant 0 : i32
    return %c0_i32, %c0_i32_0, %c0_i32_1 : i32, i32, i32
  }
}

</mosaic_0001>

<bundles_post_ra>
// kernel: conv_block_forward.1
= control target key start
LH: loop header
LB: loop body
LE: loop exit
PB: predicated region body
PF: predicated region fallthrough
CT: control target
= control target key end

     0   :  { %s1297_s19 = smov 91   ;;  %s1298_s22 = smov 92   ;;  %vm318_vm0 = vcmask 130048   ;;  %vm261_vm1 = vcmask 744448   ;;  %vm232_vm2 = vcmask 752640   ;;  %vm203_vm3 = vcmask 883712   ;;  %s2334_s0 = inlined_call_operand.vmem [shape: bf16[2,16,422], index: 0, kind: input, shape index: {}]   ;;  %s2335_s1 = inlined_call_operand.vmem [shape: bf16[8,144], index: 1, kind: input, shape index: {}]   ;;  %s2336_s2 = inlined_call_operand.vmem [shape: f32[768,1], index: 2, kind: input, shape index: {}]   ;;  %s2337_s3 = inlined_call_operand.vmem [shape: f32[8,2], index: 3, kind: input, shape index: {}]   ;;  %s2338_s4 = inlined_call_operand.vmem [shape: f32[2,8,384], index: 4, kind: output, shape index: {}]  }
   0x1   :  { %v1336_v0 = vld [vmem:[%s2334_s0 + $0x4] ss:$16 sps:$4 sm:$0xff]   ;;  %v1341_v1 = vld [vmem:[%s2334_s0] ss:$16 sps:$4 sm:$0xff]   ;;  %v1282_v2 = vld [vmem:[%s2334_s0 + $0x8] ss:$16 sps:$4 sm:$0xff]  }
   0x2   :  { %255 = vrot.lane.b32.xlu0 %v1336_v0, %s1297_s19  ;;  %253 = vrot.lane.b32.xlu1 %v1341_v1, %s1297_s19  ;;  %s1299_s23 = smov 108   ;;  %s1300_s24 = smov 109   ;;  %v1382_v3 = vld [vmem:[%s2334_s0 + $0x20] ss:$16 sps:$4 sm:$0xff]   ;;  %v1389_v4 = vld [vmem:[%s2334_s0 + $0x24] ss:$16 sps:$4 sm:$0xff]  }
   0x3   :  { %s1301_s25 = smov 110   ;;  %s1302_s26 = smov 126   ;;  %v1287_v5 = vld [vmem:[%s2334_s0 + $0xc] ss:$16 sps:$4 sm:$0xff]   ;;  %v1405_v6 = vld [vmem:[%s2335_s1] sm:$0xff]  ;;  %vm174_vm4 = vcmask 891904  }
   0x4   :  { %s1303_s27 = smov 127   ;;  %s1304_s6 = smov 90   ;;  %v1409_v7 = vcombine.high %v1405_v6, %v1405_v6  ;;  %v1288_v8 = vld [vmem:[%s2334_s0 + $0x28] ss:$16 sps:$4 sm:$0xff]   ;;  %v1290_v9 = vld [vmem:[%s2334_s0 + $0x2c] ss:$16 sps:$4 sm:$0xff]   ;;  %v1524_v56 = vcombine.low %v1405_v6, %v1405_v6 }
   0x5   :  { %vm145_vm5 = vcmask 900096   ;;  %vm116_vm6 = vcmask 1031168   ;;  %vm79_vm7 = vcmask 1039360   ;;  %vm290_vm8 = vcmask 736256   ;;  %s1307_s16 = smov 1  }
   0x6   :  { %257 = vrot.lane.b32.xlu0 %v1282_v2, %s1297_s19  ;;  %226 = vrot.lane.b32.xlu1 %v1336_v0, %s1298_s22 }
   0x7   :  { %1050 = vmatprep.mubr.msk.bf16.mxu0 %vm318_vm0, %v1409_v7  ;;  %1051 = vmatprep.mubr.msk.bf16.mxu1 %vm318_vm0, %v1409_v7 }
   0xa   :  { %228 = vrot.lane.b32.xlu0 %v1282_v2, %s1298_s22  ;;  %224 = vrot.lane.b32.xlu1 %v1341_v1, %s1298_s22 }
   0xe   :  { %197 = vrot.lane.b32.xlu0 %v1336_v0, %s1299_s23  ;;  %199 = vrot.lane.b32.xlu1 %v1282_v2, %s1299_s23 }
  0x12   :  { %195 = vrot.lane.b32.xlu0 %v1341_v1, %s1299_s23  ;;  %168 = vrot.lane.b32.xlu1 %v1336_v0, %s1300_s24 }
  0x16   :  { %170 = vrot.lane.b32.xlu0 %v1282_v2, %s1300_s24  ;;  %166 = vrot.lane.b32.xlu1 %v1341_v1, %s1300_s24 }
  0x1a   :  { %139 = vrot.lane.b32.xlu0 %v1336_v0, %s1301_s25  ;;  %141 = vrot.lane.b32.xlu1 %v1282_v2, %s1301_s25 }
  0x1e   :  { %137 = vrot.lane.b32.xlu0 %v1341_v1, %s1301_s25  ;;  %110 = vrot.lane.b32.xlu1 %v1336_v0, %s1302_s26 }
  0x22   :  { %112 = vrot.lane.b32.xlu0 %v1282_v2, %s1302_s26  ;;  %108 = vrot.lane.b32.xlu1 %v1341_v1, %s1302_s26 }
  0x26   :  { %73 = vrot.lane.b32.xlu0 %v1336_v0, %s1303_s27  ;;  %75 = vrot.lane.b32.xlu1 %v1282_v2, %s1303_s27 }
  0x2a   :  { %71 = vrot.lane.b32.xlu0 %v1341_v1, %s1303_s27  ;;  %268 = vrot.lane.b32.xlu1 %v1382_v3, %s1297_s19 }
  0x2e   :  { %270 = vrot.lane.b32.xlu0 %v1389_v4, %s1297_s19  ;;  %284 = vrot.lane.b32.xlu1 %v1336_v0, %s1304_s6 }
  0x32   :  { %286 = vrot.lane.b32.xlu0 %v1282_v2, %s1304_s6  ;;  %259 = vrot.lane.b32.xlu1 %v1287_v5, %s1297_s19 }
  0x36   :  { %282 = vrot.lane.b32.xlu0 %v1341_v1, %s1304_s6  ;;  %239 = vrot.lane.b32.xlu1 %v1382_v3, %s1298_s22 }
  0x3a   :  { %241 = vrot.lane.b32.xlu0 %v1389_v4, %s1298_s22  ;;  %230 = vrot.lane.b32.xlu1 %v1287_v5, %s1298_s22 }
  0x3e   :  { %210 = vrot.lane.b32.xlu0 %v1382_v3, %s1299_s23  ;;  %212 = vrot.lane.b32.xlu1 %v1389_v4, %s1299_s23 }
  0x42   :  { %201 = vrot.lane.b32.xlu0 %v1287_v5, %s1299_s23  ;;  %181 = vrot.lane.b32.xlu1 %v1382_v3, %s1300_s24 }
  0x46   :  { %183 = vrot.lane.b32.xlu0 %v1389_v4, %s1300_s24  ;;  %172 = vrot.lane.b32.xlu1 %v1287_v5, %s1300_s24 }
  0x4a   :  { %152 = vrot.lane.b32.xlu0 %v1382_v3, %s1301_s25  ;;  %154 = vrot.lane.b32.xlu1 %v1389_v4, %s1301_s25 }
  0x4e   :  { %143 = vrot.lane.b32.xlu0 %v1287_v5, %s1301_s25  ;;  %123 = vrot.lane.b32.xlu1 %v1382_v3, %s1302_s26 }
  0x52   :  { %125 = vrot.lane.b32.xlu0 %v1389_v4, %s1302_s26  ;;  %114 = vrot.lane.b32.xlu1 %v1287_v5, %s1302_s26 }
  0x56   :  { %94 = vrot.lane.b32.xlu0 %v1382_v3, %s1303_s27  ;;  %96 = vrot.lane.b32.xlu1 %v1389_v4, %s1303_s27 }
  0x5a   :  { %77 = vrot.lane.b32.xlu0 %v1287_v5, %s1303_s27  ;;  %272 = vrot.lane.b32.xlu1 %v1288_v8, %s1297_s19 }
  0x5e   :  { %274 = vrot.lane.b32.xlu0 %v1290_v9, %s1297_s19  ;;  %297 = vrot.lane.b32.xlu1 %v1382_v3, %s1304_s6 }
  0x62   :  { %299 = vrot.lane.b32.xlu0 %v1389_v4, %s1304_s6  ;;  %288 = vrot.lane.b32.xlu1 %v1287_v5, %s1304_s6 }
  0x66   :  { %243 = vrot.lane.b32.xlu0 %v1288_v8, %s1298_s22  ;;  %245 = vrot.lane.b32.xlu1 %v1290_v9, %s1298_s22 }
  0x6a   :  { %214 = vrot.lane.b32.xlu0 %v1288_v8, %s1299_s23  ;;  %216 = vrot.lane.b32.xlu1 %v1290_v9, %s1299_s23 }
  0x6e   :  { %185 = vrot.lane.b32.xlu0 %v1288_v8, %s1300_s24  ;;  %187 = vrot.lane.b32.xlu1 %v1290_v9, %s1300_s24 }
  0x72   :  { %156 = vrot.lane.b32.xlu0 %v1288_v8, %s1301_s25  ;;  %158 = vrot.lane.b32.xlu1 %v1290_v9, %s1301_s25 }
  0x74   :  { %v256_v10 = vpop.permute.xlu0 %255  ;;  %v254_v11 = vpop.permute.xlu1 %253 }
  0x75   :  { %v262_v15 = vsel %vm261_vm1, %v254_v11, %v256_v10 }
  0x76   :  { %127 = vrot.lane.b32.xlu0 %v1288_v8, %s1302_s26  ;;  %129 = vrot.lane.b32.xlu1 %v1290_v9, %s1302_s26 }
  0x78   :  { %v1470_v12 = vpop.permute.xlu0 %257  ;;  %v227_v13 = vpop.permute.xlu1 %226 }
  0x79   :  { %v263_v14 = vsel %vm261_vm1, %v256_v10, %v1470_v12 }
  0x7a   :  { %322 = vmatprep.subr.bf16.mxu0 %v263_v14  ;;  %98 = vrot.lane.b32.xlu0 %v1288_v8, %s1303_s27 }
  0x7b   :  { %100 = vrot.lane.b32.xlu1 %v1290_v9, %s1303_s27  ;;  %323 = vmatpush1.bf16.msra.mxu0 %v262_v15 }
  0x7c   :  { %v1477_v16 = vpop.permute.xlu0 %228  ;;  %v225_v17 = vpop.permute.xlu1 %224 }
  0x7d   :  { %v234_v18 = vsel %vm232_vm2, %v227_v13, %v1477_v16  ;;  %v233_v19 = vsel %vm232_vm2, %v225_v17, %v227_v13 }
  0x7e   :  { %301 = vrot.lane.b32.xlu0 %v1288_v8, %s1304_s6  ;;  %324 = vmatprep.subr.bf16.mxu0 %v234_v18 }
  0x7f   :  { %325 = vmatpush1.bf16.msra.mxu0 %v233_v19  ;;  %303 = vrot.lane.b32.xlu1 %v1290_v9, %s1304_s6 }
  0x80   :  { %v198_v20 = vpop.permute.xlu0 %197  ;;  %v1484_v21 = vpop.permute.xlu1 %199 }
  0x81   :  { %v205_v22 = vsel %vm203_vm3, %v198_v20, %v1484_v21 }
  0x82   :  { %326 = vmatprep.subr.bf16.mxu0 %v205_v22 }
  0x84   :  { %v196_v23 = vpop.permute.xlu0 %195  ;;  %v169_v24 = vpop.permute.xlu1 %168 }
  0x85   :  { %v204_v25 = vsel %vm203_vm3, %v196_v23, %v198_v20 }
  0x86   :  { %327 = vmatpush1.bf16.msra.mxu0 %v204_v25  ;;  %v1293_v25 = vld [vmem:[%s2334_s0 + $0x8] ss:$16 sps:$4 sm:$0xff]  }
  0x88   :  { %v1489_v26 = vpop.permute.xlu0 %170  ;;  %v167_v27 = vpop.permute.xlu1 %166 }
  0x89   :  { %v176_v28 = vsel %vm174_vm4, %v169_v24, %v1489_v26  ;;  %v175_v29 = vsel %vm174_vm4, %v167_v27, %v169_v24 }
  0x8a   :  { %328 = vmatprep.subr.bf16.mxu0 %v176_v28 }
  0x8b   :  { %329 = vmatpush1.bf16.msra.mxu0 %v175_v29 }
  0x8c   :  { %v140_v30 = vpop.permute.xlu0 %139  ;;  %v1494_v31 = vpop.permute.xlu1 %141 }
  0x8d   :  { %v147_v32 = vsel %vm145_vm5, %v140_v30, %v1494_v31 }
  0x8e   :  { %330 = vmatprep.subr.bf16.mxu0 %v147_v32 }
  0x90   :  { %v138_v33 = vpop.permute.xlu0 %137  ;;  %v111_v34 = vpop.permute.xlu1 %110 }
  0x91   :  { %v146_v35 = vsel %vm145_vm5, %v138_v33, %v140_v30 }
  0x92   :  { %331 = vmatpush1.bf16.msra.mxu0 %v146_v35  ;;  %v1587_v35 = vld [vmem:[%s2336_s2 + $0x78] sm:$0xff] }
  0x94   :  { %v1499_v36 = vpop.permute.xlu0 %112  ;;  %v109_v37 = vpop.permute.xlu1 %108 }
  0x95   :  { %v118_v38 = vsel %vm116_vm6, %v111_v34, %v1499_v36  ;;  %v117_v39 = vsel %vm116_vm6, %v109_v37, %v111_v34 }
  0x96   :  { %332 = vmatprep.subr.bf16.mxu0 %v118_v38  ;;  %v1594_v38 = vld [vmem:[%s2336_s2 + $0xf0] sm:$0xff] }
  0x97   :  { %333 = vmatpush1.bf16.msra.mxu0 %v117_v39 }
  0x98   :  { %v74_v40 = vpop.permute.xlu0 %73  ;;  %v1504_v41 = vpop.permute.xlu1 %75 }
  0x99   :  { %v81_v42 = vsel %vm79_vm7, %v74_v40, %v1504_v41 }
  0x9a   :  { %334 = vmatprep.subr.bf16.mxu0 %v81_v42 }
  0x9c   :  { %v72_v43 = vpop.permute.xlu0 %71  ;;  %v269_v44 = vpop.permute.xlu1 %268 }
  0x9d   :  { %v80_v45 = vsel %vm79_vm7, %v72_v43, %v74_v40  ;;  %v1601_v40 = vld [vmem:[%s2336_s2 + $0x70] sm:$0xff]  ;;  %v1613_v43 = vld [vmem:[%s2336_s2 + $0x68] sm:$0xff] }
  0x9e   :  { %335 = vmatpush1.bf16.msra.mxu0 %v80_v45 }
  0x9f   :  { %336 = vmatprep.subr.bf16.mxu0 %v1336_v0 }
  0xa0   :  { %v1510_v46 = vpop.permute.xlu0 %270  ;;  %v285_v47 = vpop.permute.xlu1 %284 }
  0xa1   :  { %v276_v48 = vsel %vm261_vm1, %v269_v44, %v1510_v46 }
  0xa2   :  { %363 = vmatprep.subr.bf16.mxu1 %v276_v48  ;;  %337 = vmatpush1.bf16.msra.mxu0 %v1341_v1  ;;  %v1628_v48 = vld [vmem:[%s2336_s2 + $0x60] sm:$0xff] }
  0xa4   :  { %v1515_v49 = vpop.permute.xlu0 %286  ;;  %v260_v50 = vpop.permute.xlu1 %259 }
  0xa5   :  { %v292_v51 = vsel %vm290_vm8, %v285_v47, %v1515_v49  ;;  %v264_v52 = vsel %vm261_vm1, %v1470_v12, %v260_v50 }
  0xa6   :  { %352 = vmatprep.subr.bf16.mxu0 %v292_v51  ;;  %364 = vmatpush1.bf16.msra.mxu1 %v264_v52  ;;  %v1640_v51 = vld [vmem:[%s2336_s2 + $0x58] sm:$0xff] }
  0xa8   :  { %v283_v53 = vpop.permute.xlu0 %282  ;;  %v240_v54 = vpop.permute.xlu1 %239 }
  0xa9   :  { %v291_v55 = vsel %vm290_vm8, %v283_v53, %v285_v47 }
  0xaa   :  { %353 = vmatpush2.bf16.msra.mxu0 %v291_v55 }
  0xac   :  { %v1526_v57 = vpop.permute.xlu0 %241  ;;  %v231_v58 = vpop.permute.xlu1 %230 }
  0xad   :  { %v247_v59 = vsel %vm232_vm2, %v240_v54, %v1526_v57  ;;  %355 = vmatmul.mubr.bf16.vlgmr.msra.gmra.mxu0 %v1524_v56  ;;  %v235_v60 = vsel %vm232_vm2, %v1477_v16, %v231_v58  ;;  %v1648_v54 = vld [vmem:[%s2336_s2 + $0xd0] sm:$0xff]  ;;  %v1661_v58 = vld [vmem:[%s2336_s2 + $0xc8] sm:$0xff] }
  0xae   :  { %365 = vmatprep.subr.bf16.mxu1 %v247_v59  ;;  %1052 = vmatprep.mubr.msk.bf16.mxu0 %vm318_vm0, %v1409_v7 }
  0xaf   :  { %366 = vmatpush1.bf16.msra.mxu1 %v235_v60  ;;  %v1667_v60 = vld [vmem:[%s2336_s2 + $0x48] sm:$0xff] }
  0xb0   :  { %v211_v61 = vpop.permute.xlu0 %210  ;;  %v1535_v62 = vpop.permute.xlu1 %212 }
  0xb1   :  { %v218_v63 = vsel %vm203_vm3, %v211_v61, %v1535_v62 }
  0xb2   :  { %367 = vmatprep.subr.bf16.mxu1 %v218_v63  ;;  %v1675_v63 = vld [vmem:[%s2336_s2 + $0xc0] sm:$0xff] }
  0xb4   :  { %v202_v0 = vpop.permute.xlu0 %201  ;;  %v182_v1 = vpop.permute.xlu1 %181 }
  0xb5   :  { %v206_v2 = vsel %vm203_vm3, %v1484_v21, %v202_v0 }
  0xb6   :  { %368 = vmatpush1.bf16.msra.mxu1 %v206_v2  ;;  %v1688_v2 = vld [vmem:[%s2336_s2 + $0xb8] sm:$0xff] }
  0xb8   :  { %v1541_v5 = vpop.permute.xlu0 %183  ;;  %v173_v6 = vpop.permute.xlu1 %172 }
  0xb9   :  { %v189_v7 = vsel %vm174_vm4, %v182_v1, %v1541_v5  ;;  %v177_v8 = vsel %vm174_vm4, %v1489_v26, %v173_v6  ;;  %v1682_v1 = vld [vmem:[%s2336_s2 + $0x40] sm:$0xff]  ;;  %v1694_v6 = vld [vmem:[%s2336_s2 + $0x38] sm:$0xff] }
  0xba   :  { %369 = vmatprep.subr.bf16.mxu1 %v189_v7 }
  0xbb   :  { %370 = vmatpush1.bf16.msra.mxu1 %v177_v8 }
  0xbc   :  { %v153_v9 = vpop.permute.xlu0 %152  ;;  %v1547_v10 = vpop.permute.xlu1 %154 }
  0xbd   :  { %v160_v11 = vsel %vm145_vm5, %v153_v9, %v1547_v10  ;;  %v1702_v9 = vld [vmem:[%s2336_s2 + $0xb0] sm:$0xff] }
  0xbe   :  { %371 = vmatprep.subr.bf16.mxu1 %v160_v11  ;;  %v1709_v11 = vld [vmem:[%s2336_s2 + $0x30] sm:$0xff] }
  0xc0   :  { %v144_v12 = vpop.permute.xlu0 %143  ;;  %v124_v13 = vpop.permute.xlu1 %123 }
  0xc1   :  { %v148_v14 = vsel %vm145_vm5, %v1494_v31, %v144_v12  ;;  %v1715_v12 = vld [vmem:[%s2336_s2 + $0xa8] sm:$0xff] }
  0xc2   :  { %372 = vmatpush1.bf16.msra.mxu1 %v148_v14  ;;  %v1721_v14 = vld [vmem:[%s2336_s2 + $0x28] sm:$0xff] }
  0xc4   :  { %v1553_v15 = vpop.permute.xlu0 %125  ;;  %v115_v16 = vpop.permute.xlu1 %114 }
  0xc5   :  { %v131_v17 = vsel %vm116_vm6, %v124_v13, %v1553_v15  ;;  %v119_v18 = vsel %vm116_vm6, %v1499_v36, %v115_v16 }
  0xc6   :  { %373 = vmatprep.subr.bf16.mxu1 %v131_v17  ;;  %v1294_v17 = vld [vmem:[%s2334_s0 + $0x28] ss:$16 sps:$4 sm:$0xff]  }
  0xc7   :  { %374 = vmatpush1.bf16.msra.mxu1 %v119_v18  ;;  %v1732_v18 = vld [vmem:[%s2336_s2 + $0xa0] sm:$0xff] }
  0xc8   :  { %v95_v19 = vpop.permute.xlu0 %94  ;;  %v1559_v20 = vpop.permute.xlu1 %96 }
  0xc9   :  { %v102_v21 = vsel %vm79_vm7, %v95_v19, %v1559_v20 }
  0xca   :  { %375 = vmatprep.subr.bf16.mxu1 %v102_v21  ;;  %v1745_v21 = vld [vmem:[%s2336_s2 + $0x98] sm:$0xff] }
  0xcc   :  { %v78_v22 = vpop.permute.xlu0 %77  ;;  %v273_v23 = vpop.permute.xlu1 %272 }
  0xcd   :  { %v82_v24 = vsel %vm79_vm7, %v1504_v41, %v78_v22  ;;  %v277_v29 = vsel %vm261_vm1, %v1510_v46, %v273_v23  ;;  %v1607_v41 = vld [vmem:[%s2336_s2 + $0xe8] sm:$0xff]  ;;  %v1621_v46 = vld [vmem:[%s2336_s2 + $0xe0] sm:$0xff]  ;;  %v1751_v22 = vld [vmem:[%s2336_s2 + $0x18] sm:$0xff] }
  0xce   :  { %376 = vmatpush1.bf16.msra.mxu1 %v82_v24 }
  0xcf   :  { %377 = vmatprep.subr.bf16.mxu1 %v1382_v3  ;;  %v1579_v3 = vld [vmem:[%s2336_s2 + $0xf8] sm:$0xff] }
  0xd0   :  { %v275_v26 = vpop.permute.xlu0 %274  ;;  %v298_v27 = vpop.permute.xlu1 %297 }
  0xd1   :  { %v278_v28 = vsel %vm261_vm1, %v273_v23, %v275_v26 }
  0xd2   :  { %404 = vmatprep.subr.bf16.mxu0 %v278_v28  ;;  %378 = vmatpush1.bf16.msra.mxu1 %v1293_v25  ;;  %v1757_v25 = vld [vmem:[%s2336_s2 + $0x90] sm:$0xff]  ;;  %v1770_v28 = vld [vmem:[%s2336_s2 + $0x88] sm:$0xff] }
  0xd3   :  { %405 = vmatpush1.bf16.msra.mxu0 %v277_v29  ;;  %v1777_v29 = vld [vmem:[%s2336_s2 + $0x8] sm:$0xff] }
  0xd4   :  { %v1572_v30 = vpop.permute.xlu0 %299  ;;  %v289_v31 = vpop.permute.xlu1 %288 }
  0xd5   :  { %v305_v32 = vsel %vm290_vm8, %v298_v27, %v1572_v30  ;;  %v293_v33 = vsel %vm290_vm8, %v1515_v49, %v289_v31  ;;  %v1634_v49 = vld [vmem:[%s2336_s2 + $0xd8] sm:$0xff]  ;;  %v1764_v27 = vld [vmem:[%s2336_s2 + $0x10] sm:$0xff]  ;;  %v1783_v31 = vld [vmem:[%s2336_s2 + $0x80] sm:$0xff] }
  0xd6   :  { %393 = vmatprep.subr.bf16.mxu1 %v305_v32 }
  0xd7   :  { %394 = vmatpush2.bf16.msra.mxu1 %v293_v33  ;;  %v1797_v33 = vld [vmem:[%s2336_s2 + $0x1f8] sm:$0xff] }
  0xd8   :  { %v244_v34 = vpop.permute.xlu0 %243  ;;  %1056 = vmatprep.subr.mxu1 %v1579_v3  ;;  %v246_v37 = vpop.permute.xlu1 %245 }
  0xd9   :  { %v248_v36 = vsel %vm232_vm2, %v1526_v57, %v244_v34  ;;  %v249_v39 = vsel %vm232_vm2, %v244_v34, %v246_v37  ;;  %v1655_v57 = vld [vmem:[%s2336_s2 + $0x50] sm:$0xff]  ;;  %v1812_v34 = vld [vmem:[%s2336_s2 + $0x278] sm:$0xff]  ;;  %v1830_v37 = vld [vmem:[%s2336_s2 + $0x2e8] sm:$0xff] }
  0xda   :  { %396 = vmatmul.mubr.bf16.vlgmr.msra.gmra.mxu1 %v1524_v56  ;;  %406 = vmatprep.subr.bf16.mxu0 %v249_v39  ;;  %v1836_v39 = vld [vmem:[%s2336_s2 + $0x268] sm:$0xff] }
  0xdb   :  { %1057 = vmatpush3.msra.mxu1 %v1587_v35  ;;  %407 = vmatpush1.bf16.msra.mxu0 %v248_v36  ;;  %v1818_v36 = vld [vmem:[%s2336_s2 + $0x2f0] sm:$0xff] }
  0xdc   :  { %v215_v42 = vpop.permute.xlu0 %214  ;;  %1058 = vmatprep.subr.mxu1 %v1594_v38  ;;  %v217_v45 = vpop.permute.xlu1 %216 }
  0xdd   :  { %v219_v44 = vsel %vm203_vm3, %v1535_v62, %v215_v42  ;;  %1059 = vmatpush3.msra.mxu1 %v1601_v40  ;;  %v220_v47 = vsel %vm203_vm3, %v215_v42, %v217_v45  ;;  %v1842_v42 = vld [vmem:[%s2336_s2 + $0x2e0] sm:$0xff]  ;;  %v1854_v45 = vld [vmem:[%s2336_s2 + $0x2d8] sm:$0xff] }
  0xde   :  { %1060 = vmatprep.subr.mxu1 %v1607_v41  ;;  %408 = vmatprep.subr.bf16.mxu0 %v220_v47  ;;  %v1860_v47 = vld [vmem:[%s2336_s2 + $0x258] sm:$0xff] }
  0xdf   :  { %1061 = vmatpush3.msra.mxu1 %v1613_v43  ;;  %409 = vmatpush1.bf16.msra.mxu0 %v219_v44  ;;  %v1848_v44 = vld [vmem:[%s2336_s2 + $0x260] sm:$0xff] }
  0xe0   :  { %v186_v50 = vpop.permute.xlu0 %185  ;;  %1062 = vmatprep.subr.mxu1 %v1621_v46  ;;  %v188_v53 = vpop.permute.xlu1 %187 }
  0xe1   :  { %v190_v52 = vsel %vm174_vm4, %v1541_v5, %v186_v50  ;;  %1063 = vmatpush3.msra.mxu1 %v1628_v48  ;;  %v191_v55 = vsel %vm174_vm4, %v186_v50, %v188_v53  ;;  %v1866_v50 = vld [vmem:[%s2336_s2 + $0x2d0] sm:$0xff]  ;;  %v1878_v53 = vld [vmem:[%s2336_s2 + $0x2c8] sm:$0xff] }
  0xe2   :  { %1064 = vmatprep.subr.mxu1 %v1634_v49  ;;  %410 = vmatprep.subr.bf16.mxu0 %v191_v55  ;;  %2377 = vst [vmem:[#allocation2_spill] sm:$0xff] %v1878_v53  ;;  %v1884_v55 = vld [vmem:[%s2336_s2 + $0x248] sm:$0xff] }
  0xe3   :  { %1065 = vmatpush3.msra.mxu1 %v1640_v51  ;;  %411 = vmatpush1.bf16.msra.mxu0 %v190_v52  ;;  %v1872_v52 = vld [vmem:[%s2336_s2 + $0x250] sm:$0xff]  ;;  %2378 = vst [vmem:[#allocation3_spill] sm:$0xff] %v1884_v55 }
  0xe4   :  { %v157_v59 = vpop.permute.xlu0 %156  ;;  %1066 = vmatprep.subr.mxu1 %v1648_v54  ;;  %v159_v62 = vpop.permute.xlu1 %158 }
  0xe5   :  { %v161_v61 = vsel %vm145_vm5, %v1547_v10, %v157_v59  ;;  %1067 = vmatpush3.msra.mxu1 %v1655_v57  ;;  %v162_v0 = vsel %vm145_vm5, %v157_v59, %v159_v62  ;;  %v1890_v59 = vld [vmem:[%s2336_s2 + $0x2c0] sm:$0xff]  ;;  %v1902_v62 = vld [vmem:[%s2336_s2 + $0x2b8] sm:$0xff] }
  0xe6   :  { %1068 = vmatprep.subr.mxu1 %v1661_v58  ;;  %412 = vmatprep.subr.bf16.mxu0 %v162_v0  ;;  %2379 = vst [vmem:[#allocation4_spill] sm:$0xff] %v1890_v59  ;;  %2381 = vst [vmem:[#allocation6_spill] sm:$0xff] %v1902_v62  ;;  %v1908_v0 = vld [vmem:[%s2336_s2 + $0x238] sm:$0xff] }
  0xe7   :  { %1069 = vmatpush3.msra.mxu1 %v1667_v60  ;;  %413 = vmatpush1.bf16.msra.mxu0 %v161_v61  ;;  %v1896_v61 = vld [vmem:[%s2336_s2 + $0x240] sm:$0xff]  ;;  %2382 = vst [vmem:[#allocation7_spill] sm:$0xff] %v1908_v0 }
  0xe8   :  { %v128_v5 = vpop.permute.xlu0 %127  ;;  %1070 = vmatprep.subr.mxu1 %v1675_v63  ;;  %v130_v8 = vpop.permute.xlu1 %129  ;;  %2380 = vst [vmem:[#allocation5_spill] sm:$0xff] %v1896_v61 }
  0xe9   :  { %v132_v7 = vsel %vm116_vm6, %v1553_v15, %v128_v5  ;;  %1071 = vmatpush3.msra.mxu1 %v1682_v1  ;;  %v133_v10 = vsel %vm116_vm6, %v128_v5, %v130_v8  ;;  %v1914_v5 = vld [vmem:[%s2336_s2 + $0x2b0] sm:$0xff]  ;;  %v1926_v8 = vld [vmem:[%s2336_s2 + $0x2a8] sm:$0xff] }
  0xea   :  { %1072 = vmatprep.subr.mxu1 %v1688_v2  ;;  %414 = vmatprep.subr.bf16.mxu0 %v133_v10  ;;  %2383 = vst [vmem:[#allocation8_spill] sm:$0xff] %v1914_v5  ;;  %2385 = vst [vmem:[#allocation10_spill] sm:$0xff] %v1926_v8  ;;  %v1932_v10 = vld [vmem:[%s2336_s2 + $0x228] sm:$0xff] }
  0xeb   :  { %1073 = vmatpush3.msra.mxu1 %v1694_v6  ;;  %415 = vmatpush1.bf16.msra.mxu0 %v132_v7  ;;  %v1920_v7 = vld [vmem:[%s2336_s2 + $0x230] sm:$0xff]  ;;  %2386 = vst [vmem:[#allocation11_spill] sm:$0xff] %v1932_v10 }
  0xec   :  { %v99_v13 = vpop.permute.xlu0 %98  ;;  %1074 = vmatprep.subr.mxu1 %v1702_v9  ;;  %2384 = vst [vmem:[#allocation9_spill] sm:$0xff] %v1920_v7 }
  0xed   :  { %v103_v15 = vsel %vm79_vm7, %v1559_v20, %v99_v13  ;;  %v101_v16 = vpop.permute.xlu1 %100  ;;  %1075 = vmatpush3.msra.mxu1 %v1709_v11  ;;  %v1739_v20 = vld [vmem:[%s2336_s2 + $0x20] sm:$0xff] }
  0xee   :  { %v104_v19 = vsel %vm79_vm7, %v99_v13, %v101_v16  ;;  %1076 = vmatprep.subr.mxu1 %v1715_v12  ;;  %v1938_v13 = vld [vmem:[%s2336_s2 + $0x2a0] sm:$0xff]  ;;  %v1950_v16 = vld [vmem:[%s2336_s2 + $0x298] sm:$0xff] }
  0xef   :  { %416 = vmatprep.subr.bf16.mxu0 %v104_v19  ;;  %1077 = vmatpush3.msra.mxu1 %v1721_v14  ;;  %2387 = vst [vmem:[#allocation12_spill] sm:$0xff] %v1938_v13  ;;  %2389 = vst [vmem:[#allocation14_spill] sm:$0xff] %v1950_v16  ;;  %v1962_v19 = vld [vmem:[%s2336_s2 + $0x290] sm:$0xff] }
  0xf0   :  { %417 = vmatpush1.bf16.msra.mxu0 %v103_v15  ;;  %1078 = vmatprep.subr.mxu1 %v1732_v18  ;;  %v302_v23 = vpop.permute.xlu0 %301  ;;  %v1944_v15 = vld [vmem:[%s2336_s2 + $0x220] sm:$0xff]  ;;  %2391 = vst [vmem:[#allocation16_spill] sm:$0xff] %v1962_v19 }
  0xf1   :  { %418 = vmatprep.subr.bf16.mxu0 %v1294_v17  ;;  %v304_v24 = vpop.permute.xlu1 %303  ;;  %1079 = vmatpush3.msra.mxu1 %v1739_v20  ;;  %v306_v32 = vsel %vm290_vm8, %v1572_v30, %v302_v23  ;;  %v1806_v30 = vld [vmem:[%s2336_s2 + $0x2f8] sm:$0xff]  ;;  %2388 = vst [vmem:[#allocation13_spill] sm:$0xff] %v1944_v15 }
  0xf2   :  { %v307_v26 = vsel %vm290_vm8, %v302_v23, %v304_v24  ;;  %1080 = vmatprep.subr.mxu1 %v1745_v21  ;;  %v1956_v17 = vld [vmem:[%s2336_s2 + $0x218] sm:$0xff]  ;;  %v1968_v23 = vld [vmem:[%s2336_s2 + $0x210] sm:$0xff]  ;;  %v1974_v24 = vld [vmem:[%s2336_s2 + $0x288] sm:$0xff] }
  0xf3   :  { %1081 = vmatpush3.msra.mxu1 %v1751_v22  ;;  %2390 = vst [vmem:[#allocation15_spill] sm:$0xff] %v1956_v17  ;;  %2392 = vst [vmem:[#allocation17_spill] sm:$0xff] %v1968_v23 }
  0xf4   :  { %419 = vmatpush1.bf16.msra.mxu0 %v1389_v4  ;;  %1082 = vmatprep.subr.mxu1 %v1757_v25  ;;  %v1789_v4 = vld [vmem:[%s2336_s2] sm:$0xff]  ;;  %2393 = vst [vmem:[#allocation18_spill] sm:$0xff] %v1974_v24 }
  0xf5   :  { %434 = vmatprep.subr.bf16.mxu0 %v307_v26  ;;  %1083 = vmatpush3.msra.mxu1 %v1764_v27  ;;  %v1980_v26 = vld [vmem:[%s2336_s2 + $0x208] sm:$0xff] }
  0xf6   :  { %1084 = vmatprep.subr.mxu1 %v1770_v28  ;;  %2394 = vst [vmem:[#allocation19_spill] sm:$0xff] %v1980_v26 }
  0xf7   :  { %1085 = vmatpush3.msra.mxu1 %v1777_v29 }
  0xf8   :  { %435 = vmatpush2.bf16.msra.mxu0 %v306_v32  ;;  %1086 = vmatprep.subr.mxu1 %v1783_v31  ;;  %v1986_v32 = vld [vmem:[%s2336_s2 + $0x280] sm:$0xff] }
  0xf9   :  { %1087 = vmatpush3.msra.mxu1 %v1789_v4  ;;  %1126 = vmatprep.subr.mxu0 %v1806_v30  ;;  %2395 = vst [vmem:[#allocation20_spill] sm:$0xff] %v1986_v32 }
  0xfa   :  { %1091 = vmatprep.subr.mxu1 %v1797_v33 }
  0xfb   :  { %437 = vmatmul.mubr.bf16.vlgmr.msra.gmra.mxu0 %v1524_v56  ;;  %v1824_v56 = vld [vmem:[%s2336_s2 + $0x270] sm:$0xff] }
  0xfc   :  { %1127 = vmatpush3.msra.mxu0 %v1812_v34 }
  0xfd   :  { %1128 = vmatprep.subr.mxu0 %v1818_v36 }
  0xfe   :  { %1129 = vmatpush3.msra.mxu0 %v1824_v56 }
  0xff   :  { %1130 = vmatprep.subr.mxu0 %v1830_v37 }
 0x100   :  { %1131 = vmatpush3.msra.mxu0 %v1836_v39 }
 0x101   :  { %1132 = vmatprep.subr.mxu0 %v1842_v42 }
 0x102   :  { %1133 = vmatpush3.msra.mxu0 %v1848_v44 }
 0x103   :  { %1134 = vmatprep.subr.mxu0 %v1854_v45 }
 0x104   :  { %1135 = vmatpush3.msra.mxu0 %v1860_v47 }
 0x105   :  { %1136 = vmatprep.subr.mxu0 %v1866_v50 }
 0x106   :  { %1137 = vmatpush3.msra.mxu0 %v1872_v52 }
 0x107   :  { %1138 = vmatprep.subr.mxu0 %v1878_v53  ;;  %v2105_v53 = vld [vmem:[%s2336_s2 + $0x1b0] sm:$0xff] }
 0x108   :  { %1139 = vmatpush3.msra.mxu0 %v1884_v55  ;;  %v2099_v55 = vld [vmem:[%s2336_s2 + $0x138] sm:$0xff]  ;;  %2403 = vst [vmem:[#allocation28_spill] sm:$0xff] %v2105_v53 }
 0x109   :  { %1140 = vmatprep.subr.mxu0 %v1890_v59  ;;  %v2093_v59 = vld [vmem:[%s2336_s2 + $0x1b8] sm:$0xff]  ;;  %2402 = vst [vmem:[#allocation27_spill] sm:$0xff] %v2099_v55 }
 0x10a   :  { %1141 = vmatpush3.msra.mxu0 %v1896_v61  ;;  %v2087_v61 = vld [vmem:[%s2336_s2 + $0x140] sm:$0xff]  ;;  %2401 = vst [vmem:[#allocation26_spill] sm:$0xff] %v2093_v59 }
 0x10b   :  { %1142 = vmatprep.subr.mxu0 %v1902_v62  ;;  %v2081_v62 = vld [vmem:[%s2336_s2 + $0x1c0] sm:$0xff]  ;;  %2400 = vst [vmem:[#allocation25_spill] sm:$0xff] %v2087_v61 }
 0x10c   :  { %1143 = vmatpush3.msra.mxu0 %v1908_v0  ;;  %v2075_v0 = vld [vmem:[%s2336_s2 + $0x148] sm:$0xff]  ;;  %2399 = vst [vmem:[#allocation24_spill] sm:$0xff] %v2081_v62 }
 0x10d   :  { %1144 = vmatprep.subr.mxu0 %v1914_v5  ;;  %v2069_v5 = vld [vmem:[%s2336_s2 + $0x1c8] sm:$0xff]  ;;  %2398 = vst [vmem:[#allocation23_spill] sm:$0xff] %v2075_v0 }
 0x10e   :  { %1145 = vmatpush3.msra.mxu0 %v1920_v7  ;;  %v2063_v7 = vld [vmem:[%s2336_s2 + $0x150] sm:$0xff]  ;;  %2397 = vst [vmem:[#allocation22_spill] sm:$0xff] %v2069_v5 }
 0x10f   :  { %1146 = vmatprep.subr.mxu0 %v1926_v8  ;;  %v2057_v8 = vld [vmem:[%s2336_s2 + $0x1d0] sm:$0xff] }
 0x110   :  { %1147 = vmatpush3.msra.mxu0 %v1932_v10  ;;  %v2051_v10 = vld [vmem:[%s2336_s2 + $0x158] sm:$0xff] }
 0x111   :  { %1148 = vmatprep.subr.mxu0 %v1938_v13  ;;  %v2045_v13 = vld [vmem:[%s2336_s2 + $0x1d8] sm:$0xff] }
 0x112   :  { %1149 = vmatpush3.msra.mxu0 %v1944_v15  ;;  %v2033_v15 = vld [vmem:[%s2336_s2 + $0x1e0] sm:$0xff] }
 0x113   :  { %1150 = vmatprep.subr.mxu0 %v1950_v16 }
 0x114   :  { %1151 = vmatpush3.msra.mxu0 %v1956_v17 }
 0x115   :  { %1152 = vmatprep.subr.mxu0 %v1962_v19 }
 0x116   :  { %1153 = vmatpush3.msra.mxu0 %v1968_v23  ;;  %v1992_v23 = vld [vmem:[%s2336_s2 + $0x200] sm:$0xff] }
 0x117   :  { %1154 = vmatprep.subr.mxu0 %v1974_v24  ;;  %2396 = vst [vmem:[#allocation21_spill] sm:$0xff] %v1992_v23 }
 0x118   :  { %1155 = vmatpush3.msra.mxu0 %v1980_v26  ;;  %v2003_v26 = vld [vmem:[%s2336_s2 + $0x178] sm:$0xff] }
 0x119   :  { %1156 = vmatprep.subr.mxu0 %v1986_v32  ;;  %v2009_v32 = vld [vmem:[%s2336_s2 + $0x1f0] sm:$0xff] }
 0x11a   :  { %1157 = vmatpush3.msra.mxu0 %v1992_v23  ;;  %v2021_v23 = vld [vmem:[%s2336_s2 + $0x1e8] sm:$0xff] }
 0x11b   :  { %1196 = vmatprep.subr.mxu0 %v1797_v33  ;;  %v2015_v33 = vld [vmem:[%s2336_s2 + $0x170] sm:$0xff] }
 0x16d   :  { %v1996_v24 = vpop.f32.mrf.mxu0 }
 0x16f   :  { %v1998_v19 = vpop.f32.mrf.mxu0 }
 0x170   :  { %605 = vmatprep.mubr.f32.mxu1 %v1998_v19 }
 0x171   :  { %v360_v17 = vpop.f32.mrf.mxu0  ;;  %606 = vmatmul.mubr.f32.vlgmr.msra.gmra.mxu1 %v1996_v24 }
 0x172   :  { %1092 = vmatpush3.msra.mxu1 %v2003_v26  ;;  %v2027_v17 = vld [vmem:[%s2336_s2 + $0x168] sm:$0xff] }
 0x173   :  { %v361_v16 = vpop.f32.mrf.mxu0  ;;  %1093 = vmatprep.subr.mxu1 %v2009_v32 }
 0x174   :  { %1094 = vmatpush3.msra.mxu1 %v2015_v33  ;;  %v2039_v16 = vld [vmem:[%s2336_s2 + $0x160] sm:$0xff] }
 0x175   :  { %1095 = vmatprep.subr.mxu1 %v2021_v23 }
 0x176   :  { %1096 = vmatpush3.msra.mxu1 %v2027_v17 }
 0x177   :  { %1097 = vmatprep.subr.mxu1 %v2033_v15 }
 0x178   :  { %1098 = vmatpush3.msra.mxu1 %v2039_v16 }
 0x179   :  { %1099 = vmatprep.subr.mxu1 %v2045_v13 }
 0x17a   :  { %1100 = vmatpush3.msra.mxu1 %v2051_v10 }
 0x17b   :  { %1101 = vmatprep.subr.mxu1 %v2057_v8 }
 0x17c   :  { %1102 = vmatpush3.msra.mxu1 %v2063_v7 }
 0x17d   :  { %1103 = vmatprep.subr.mxu1 %v2069_v5 }
 0x17e   :  { %1104 = vmatpush3.msra.mxu1 %v2075_v0  ;;  %v2111_v0 = vld [vmem:[%s2336_s2 + $0x130] sm:$0xff] }
 0x17f   :  { %1105 = vmatprep.subr.mxu1 %v2081_v62  ;;  %2404 = vst [vmem:[#allocation29_spill] sm:$0xff] %v2111_v0  ;;  %v2117_v62 = vld [vmem:[%s2336_s2 + $0x1a8] sm:$0xff] }
 0x180   :  { %1106 = vmatpush3.msra.mxu1 %v2087_v61  ;;  %2405 = vst [vmem:[#allocation30_spill] sm:$0xff] %v2117_v62  ;;  %v2123_v61 = vld [vmem:[%s2336_s2 + $0x128] sm:$0xff] }
 0x181   :  { %1107 = vmatprep.subr.mxu1 %v2093_v59  ;;  %2406 = vst [vmem:[#allocation31_spill] sm:$0xff] %v2123_v61  ;;  %v2129_v59 = vld [vmem:[%s2336_s2 + $0x1a0] sm:$0xff] }
 0x182   :  { %1108 = vmatpush3.msra.mxu1 %v2099_v55  ;;  %2407 = vst [vmem:[#allocation32_spill] sm:$0xff] %v2129_v59  ;;  %v2135_v55 = vld [vmem:[%s2336_s2 + $0x120] sm:$0xff] }
 0x183   :  { %1109 = vmatprep.subr.mxu1 %v2105_v53  ;;  %2408 = vst [vmem:[#allocation33_spill] sm:$0xff] %v2135_v55  ;;  %v2141_v53 = vld [vmem:[%s2336_s2 + $0x198] sm:$0xff] }
 0x184   :  { %1110 = vmatpush3.msra.mxu1 %v2111_v0  ;;  %2409 = vst [vmem:[#allocation34_spill] sm:$0xff] %v2141_v53  ;;  %v2147_v0 = vld [vmem:[%s2336_s2 + $0x118] sm:$0xff] }
 0x185   :  { %1111 = vmatprep.subr.mxu1 %v2117_v62  ;;  %2410 = vst [vmem:[#allocation35_spill] sm:$0xff] %v2147_v0  ;;  %v2153_v62 = vld [vmem:[%s2336_s2 + $0x190] sm:$0xff] }
 0x186   :  { %1112 = vmatpush3.msra.mxu1 %v2123_v61  ;;  %2411 = vst [vmem:[#allocation36_spill] sm:$0xff] %v2153_v62  ;;  %v2159_v61 = vld [vmem:[%s2336_s2 + $0x110] sm:$0xff] }
 0x187   :  { %1113 = vmatprep.subr.mxu1 %v2129_v59  ;;  %2412 = vst [vmem:[#allocation37_spill] sm:$0xff] %v2159_v61  ;;  %v2165_v59 = vld [vmem:[%s2336_s2 + $0x188] sm:$0xff] }
 0x188   :  { %1114 = vmatpush3.msra.mxu1 %v2135_v55  ;;  %2413 = vst [vmem:[#allocation38_spill] sm:$0xff] %v2165_v59  ;;  %v2171_v55 = vld [vmem:[%s2336_s2 + $0x108] sm:$0xff] }
 0x189   :  { %1115 = vmatprep.subr.mxu1 %v2141_v53  ;;  %v2177_v53 = vld [vmem:[%s2336_s2 + $0x180] sm:$0xff] }
 0x18a   :  { %1116 = vmatpush3.msra.mxu1 %v2147_v0  ;;  %v2183_v0 = vld [vmem:[%s2336_s2 + $0x100] sm:$0xff] }
 0x18b   :  { %1117 = vmatprep.subr.mxu1 %v2153_v62  ;;  %2414 = vst [vmem:[#allocation39_spill] sm:$0xff] %v2183_v0 }
 0x18c   :  { %1118 = vmatpush3.msra.mxu1 %v2159_v61 }
 0x18d   :  { %1119 = vmatprep.subr.mxu1 %v2165_v59  ;;  %v752_v59 = vmul.f32 %v1998_v19, %v1998_v19 }
 0x18e   :  { %1120 = vmatpush3.msra.mxu1 %v2171_v55 }
 0x18f   :  { %1121 = vmatprep.subr.mxu1 %v2177_v53 }
 0x190   :  { %1122 = vmatpush3.msra.mxu1 %v2183_v0 }
 0x191   :  { %1161 = vmatprep.subr.mxu1 %v1579_v3 }
 0x19a   :  { %v2189_v61 = vpop.f32.mrf.mxu1 }
 0x19c   :  { %v2191_v62 = vpop.f32.mrf.mxu1 }
 0x19d   :  { %675 = vmatprep.mubr.f32.mxu1 %v2191_v62 }
 0x19e   :  { %v401_v5 = vpop.f32.mrf.mxu1  ;;  %676 = vmatmul.mubr.f32.vlgmr.msra.gmra.mxu1 %v2189_v61 }
 0x19f   :  { %1162 = vmatpush3.msra.mxu1 %v1587_v35  ;;  %821 = vmatprep.mubr.f32.mxu1 %v752_v59  ;;  %v751_v35 = vmul.f32 %v1996_v24, %v1996_v24  ;;  %v2450_v59 = vld [vmem:[#allocation20_spill] sm:$0xff]  ;;  %v2452_v5 = vld [vmem:[#allocation21_spill] sm:$0xff] }
 0x1a0   :  { %1163 = vmatprep.subr.mxu1 %v1594_v38  ;;  %v402_v0 = vpop.f32.mrf.mxu1 }
 0x1a1   :  { %1164 = vmatpush3.msra.mxu1 %v1601_v40  ;;  %v2451_v0 = vld [vmem:[#allocation39_spill] sm:$0xff] }
 0x1a2   :  { %1165 = vmatprep.subr.mxu1 %v1607_v41  ;;  %v754_v41 = vmul.f32 %v2191_v62, %v2191_v62 }
 0x1a3   :  { %1166 = vmatpush3.msra.mxu1 %v1613_v43 }
 0x1a4   :  { %1167 = vmatprep.subr.mxu1 %v1621_v46 }
 0x1a5   :  { %1168 = vmatpush3.msra.mxu1 %v1628_v48  ;;  %v2415_v48 = vld [vmem:[#allocation22_spill] sm:$0xff] }
 0x1a6   :  { %1169 = vmatprep.subr.mxu1 %v1634_v49  ;;  %v2416_v49 = vld [vmem:[#allocation2_spill] sm:$0xff] }
 0x1a7   :  { %1170 = vmatpush3.msra.mxu1 %v1640_v51  ;;  %v2417_v51 = vld [vmem:[#allocation23_spill] sm:$0xff] }
 0x1a8   :  { %1171 = vmatprep.subr.mxu1 %v1648_v54  ;;  %v2418_v54 = vld [vmem:[#allocation3_spill] sm:$0xff] }
 0x1a9   :  { %1172 = vmatpush3.msra.mxu1 %v1655_v57  ;;  %v2419_v57 = vld [vmem:[#allocation24_spill] sm:$0xff] }
 0x1aa   :  { %1173 = vmatprep.subr.mxu1 %v1661_v58  ;;  %v2420_v58 = vld [vmem:[#allocation4_spill] sm:$0xff] }
 0x1ab   :  { %1174 = vmatpush3.msra.mxu1 %v1667_v60  ;;  %v2421_v60 = vld [vmem:[#allocation25_spill] sm:$0xff] }
 0x1ac   :  { %1175 = vmatprep.subr.mxu1 %v1675_v63  ;;  %v2422_v63 = vld [vmem:[#allocation5_spill] sm:$0xff] }
 0x1ad   :  { %1176 = vmatpush3.msra.mxu1 %v1682_v1  ;;  %v2423_v1 = vld [vmem:[#allocation26_spill] sm:$0xff] }
 0x1ae   :  { %1177 = vmatprep.subr.mxu1 %v1688_v2  ;;  %v2424_v2 = vld [vmem:[#allocation6_spill] sm:$0xff] }
 0x1af   :  { %1178 = vmatpush3.msra.mxu1 %v1694_v6  ;;  %v2425_v6 = vld [vmem:[#allocation27_spill] sm:$0xff] }
 0x1b0   :  { %1179 = vmatprep.subr.mxu1 %v1702_v9  ;;  %v2426_v9 = vld [vmem:[#allocation7_spill] sm:$0xff] }
 0x1b1   :  { %1180 = vmatpush3.msra.mxu1 %v1709_v11  ;;  %v2427_v11 = vld [vmem:[#allocation28_spill] sm:$0xff] }
 0x1b2   :  { %1181 = vmatprep.subr.mxu1 %v1715_v12  ;;  %v2428_v12 = vld [vmem:[#allocation8_spill] sm:$0xff] }
 0x1b3   :  { %1182 = vmatpush3.msra.mxu1 %v1721_v14  ;;  %v2429_v14 = vld [vmem:[#allocation29_spill] sm:$0xff] }
 0x1b4   :  { %1183 = vmatprep.subr.mxu1 %v1732_v18  ;;  %v2430_v18 = vld [vmem:[#allocation9_spill] sm:$0xff] }
 0x1b5   :  { %1184 = vmatpush3.msra.mxu1 %v1739_v20  ;;  %v2431_v20 = vld [vmem:[#allocation30_spill] sm:$0xff] }
 0x1b6   :  { %1185 = vmatprep.subr.mxu1 %v1745_v21  ;;  %v2432_v21 = vld [vmem:[#allocation10_spill] sm:$0xff] }
 0x1b7   :  { %1186 = vmatpush3.msra.mxu1 %v1751_v22  ;;  %v2433_v22 = vld [vmem:[#allocation31_spill] sm:$0xff] }
 0x1b8   :  { %1187 = vmatprep.subr.mxu1 %v1757_v25  ;;  %v2434_v25 = vld [vmem:[#allocation11_spill] sm:$0xff] }
 0x1b9   :  { %1188 = vmatpush3.msra.mxu1 %v1764_v27  ;;  %v2435_v27 = vld [vmem:[#allocation32_spill] sm:$0xff] }
 0x1ba   :  { %1189 = vmatprep.subr.mxu1 %v1770_v28  ;;  %v2436_v28 = vld [vmem:[#allocation12_spill] sm:$0xff] }
 0x1bb   :  { %v2225_v3 = vpop.f32.mrf.mxu0  ;;  %1190 = vmatpush3.msra.mxu1 %v1777_v29  ;;  %v2437_v29 = vld [vmem:[#allocation33_spill] sm:$0xff] }
 0x1bc   :  { %1191 = vmatprep.subr.mxu1 %v1783_v31  ;;  %v2438_v31 = vld [vmem:[#allocation13_spill] sm:$0xff] }
 0x1bd   :  { %v2231_v38 = vpop.f32.mrf.mxu0  ;;  %1192 = vmatpush3.msra.mxu1 %v1789_v4  ;;  %v2439_v4 = vld [vmem:[#allocation34_spill] sm:$0xff] }
 0x1be   :  { %v756_v40 = vmul.f32 %v2231_v38, %v2231_v38  ;;  %745 = vmatprep.mubr.f32.mxu0 %v2231_v38  ;;  %822 = vmatmul.mubr.f32.vlgmr.msra.gmra.mxu1 %v751_v35 }
 0x1bf   :  { %1231 = vmatprep.subr.mxu1 %v1806_v30  ;;  %v442_v43 = vpop.f32.mrf.mxu0  ;;  %746 = vmatmul.mubr.f32.vlgmr.msra.gmra.mxu0 %v2225_v3  ;;  %v2440_v30 = vld [vmem:[#allocation14_spill] sm:$0xff] }
 0x1c0   :  { %1197 = vmatpush3.msra.mxu0 %v2003_v26  ;;  %1232 = vmatpush3.msra.mxu1 %v1812_v34  ;;  %v2441_v34 = vld [vmem:[#allocation35_spill] sm:$0xff] }
 0x1c1   :  { %1198 = vmatprep.subr.mxu0 %v2009_v32  ;;  %891 = vmatprep.mubr.f32.mxu0 %v754_v41  ;;  %v443_v46 = vpop.f32.mrf.mxu0 }
 0x1c2   :  { %1233 = vmatprep.subr.mxu1 %v1818_v36  ;;  %961 = vmatprep.mubr.f32.mxu1 %v756_v40  ;;  %v2442_v36 = vld [vmem:[#allocation15_spill] sm:$0xff] }
 0x1c3   :  { %1199 = vmatpush3.msra.mxu0 %v2015_v33  ;;  %1234 = vmatpush3.msra.mxu1 %v1824_v56  ;;  %v2443_v56 = vld [vmem:[#allocation36_spill] sm:$0xff] }
 0x1c4   :  { %1200 = vmatprep.subr.mxu0 %v2021_v23  ;;  %1235 = vmatprep.subr.mxu1 %v1830_v37  ;;  %v2444_v37 = vld [vmem:[#allocation16_spill] sm:$0xff] }
 0x1c5   :  { %1201 = vmatpush3.msra.mxu0 %v2027_v17  ;;  %1236 = vmatpush3.msra.mxu1 %v1836_v39  ;;  %v2445_v39 = vld [vmem:[#allocation37_spill] sm:$0xff] }
 0x1c6   :  { %1202 = vmatprep.subr.mxu0 %v2033_v15  ;;  %1237 = vmatprep.subr.mxu1 %v1842_v42  ;;  %v2446_v42 = vld [vmem:[#allocation17_spill] sm:$0xff] }
 0x1c7   :  { %1203 = vmatpush3.msra.mxu0 %v2039_v16  ;;  %1238 = vmatpush3.msra.mxu1 %v1848_v44  ;;  %v2447_v44 = vld [vmem:[#allocation38_spill] sm:$0xff] }
 0x1c8   :  { %1204 = vmatprep.subr.mxu0 %v2045_v13  ;;  %1239 = vmatprep.subr.mxu1 %v1854_v45  ;;  %v2448_v45 = vld [vmem:[#allocation18_spill] sm:$0xff] }
 0x1c9   :  { %1205 = vmatpush3.msra.mxu0 %v2051_v10  ;;  %1240 = vmatpush3.msra.mxu1 %v1860_v47  ;;  %v2449_v47 = vld [vmem:[#allocation19_spill] sm:$0xff] }
 0x1ca   :  { %1206 = vmatprep.subr.mxu0 %v2057_v8  ;;  %1241 = vmatprep.subr.mxu1 %v1866_v50  ;;  %v753_v50 = vmul.f32 %v2189_v61, %v2189_v61 }
 0x1cb   :  { %1207 = vmatpush3.msra.mxu0 %v2063_v7  ;;  %1242 = vmatpush3.msra.mxu1 %v1872_v52  ;;  %v755_v52 = vmul.f32 %v2225_v3, %v2225_v3  ;;  %v1305_v7 = vmov 0  }
 0x1cc   :  { %1208 = vmatprep.subr.mxu0 %v2415_v48  ;;  %1243 = vmatprep.subr.mxu1 %v2416_v49 }
 0x1cd   :  { %1209 = vmatpush3.msra.mxu0 %v2417_v51  ;;  %1244 = vmatpush3.msra.mxu1 %v2418_v54 }
 0x1ce   :  { %1210 = vmatprep.subr.mxu0 %v2419_v57  ;;  %1245 = vmatprep.subr.mxu1 %v2420_v58 }
 0x1cf   :  { %1211 = vmatpush3.msra.mxu0 %v2421_v60  ;;  %1246 = vmatpush3.msra.mxu1 %v2422_v63 }
 0x1d0   :  { %1212 = vmatprep.subr.mxu0 %v2423_v1  ;;  %1247 = vmatprep.subr.mxu1 %v2424_v2 }
 0x1d1   :  { %1213 = vmatpush3.msra.mxu0 %v2425_v6  ;;  %1248 = vmatpush3.msra.mxu1 %v2426_v9  ;;  %v1306_v6 = vmov 1   ;;  %v971_v9 = vld [vmem:[%s2337_s3] sm:$0xff] }
 0x1d2   :  { %1214 = vmatprep.subr.mxu0 %v2427_v11  ;;  %1249 = vmatprep.subr.mxu1 %v2428_v12 }
 0x1d3   :  { %1215 = vmatpush3.msra.mxu0 %v2429_v14  ;;  %1250 = vmatpush3.msra.mxu1 %v2430_v18 }
 0x1d4   :  { %1216 = vmatprep.subr.mxu0 %v2431_v20  ;;  %1251 = vmatprep.subr.mxu1 %v2432_v21 }
 0x1d5   :  { %1217 = vmatpush3.msra.mxu0 %v2433_v22  ;;  %1252 = vmatpush3.msra.mxu1 %v2434_v25 }
 0x1d6   :  { %1218 = vmatprep.subr.mxu0 %v2435_v27  ;;  %1253 = vmatprep.subr.mxu1 %v2436_v28 }
 0x1d7   :  { %1219 = vmatpush3.msra.mxu0 %v2437_v29  ;;  %1254 = vmatpush3.msra.mxu1 %v2438_v31 }
 0x1d8   :  { %1220 = vmatprep.subr.mxu0 %v2439_v4  ;;  %1255 = vmatprep.subr.mxu1 %v2440_v30 }
 0x1d9   :  { %1221 = vmatpush3.msra.mxu0 %v2441_v34  ;;  %1256 = vmatpush3.msra.mxu1 %v2442_v36 }
 0x1da   :  { %1222 = vmatprep.subr.mxu0 %v2443_v56  ;;  %1257 = vmatprep.subr.mxu1 %v2444_v37 }
 0x1db   :  { %1223 = vmatpush3.msra.mxu0 %v2445_v39  ;;  %1258 = vmatpush3.msra.mxu1 %v2446_v42 }
 0x1dc   :  { %1224 = vmatprep.subr.mxu0 %v2447_v44  ;;  %1259 = vmatprep.subr.mxu1 %v2448_v45 }
 0x1dd   :  { %1225 = vmatpush3.msra.mxu0 %v2171_v55  ;;  %1260 = vmatpush3.msra.mxu1 %v2449_v47 }
 0x1de   :  { %1226 = vmatprep.subr.mxu0 %v2177_v53  ;;  %1261 = vmatprep.subr.mxu1 %v2450_v59 }
 0x1df   :  { %1227 = vmatpush3.msra.mxu0 %v2451_v0  ;;  %1262 = vmatpush3.msra.mxu1 %v2452_v5 }
 0x1e0   :  { %892 = vmatmul.mubr.f32.vlgmr.msra.gmra.mxu0 %v753_v50  ;;  %962 = vmatmul.mubr.f32.vlgmr.msra.gmra.mxu1 %v755_v52 }
 0x1e1   :  { %1277 = vset.pattern.permute.xlu1 %v1305_v7  ;;  %1278 = vset.pattern.permute.xlu0 %v1306_v6 }
 0x231   :  { %v1088_v55 = vpop.f32.mrf.mxu1 }
 0x233   :  { %v1089_v8 = vpop.f32.mrf.mxu1 }
 0x234   :  { %v1090_v33 = vadd.f32 %v1089_v8, %v1088_v55 }
 0x25e   :  { %v1123_v10 = vpop.f32.mrf.mxu1 }
 0x260   :  { %v1124_v15 = vpop.f32.mrf.mxu1 }
 0x261   :  { %v1125_v32 = vadd.f32 %v1124_v15, %v1123_v10 }
 0x263   :  { %v678_v16 = vadd.f32 %v1125_v32, %v1090_v33 }
 0x27e   :  { %v1193_v23 = vpop.f32.mrf.mxu1 }
 0x27f   :  { %v1158_v13 = vpop.f32.mrf.mxu0 }
 0x280   :  { %v1194_v17 = vpop.f32.mrf.mxu1 }
 0x281   :  { %v1159_v26 = vpop.f32.mrf.mxu0  ;;  %v1195_v48 = vadd.f32 %v1194_v17, %v1193_v23 }
 0x282   :  { %v1160_v53 = vadd.f32 %v1159_v26, %v1158_v13 }
 0x284   :  { %v748_v41 = vadd.f32 %v1160_v53, %v678_v16 }
 0x286   :  { %v967_v51 = vmul.f32 0.001953125, %v748_v41 }
 0x288   :  { %v969_v60 = vmul.f32 %v967_v51, %v967_v51 }
 0x2a0   :  { %v1228_v35 = vpop.f32.mrf.mxu0  ;;  %v1263_v40 = vpop.f32.mrf.mxu1 }
 0x2a2   :  { %v1229_v43 = vpop.f32.mrf.mxu0  ;;  %v1264_v46 = vpop.f32.mrf.mxu1 }
 0x2a3   :  { %v1230_v49 = vadd.f32 %v1229_v43, %v1228_v35  ;;  %v1265_v57 = vadd.f32 %v1264_v46, %v1263_v40 }
 0x2a5   :  { %v894_v54 = vadd.f32 %v1230_v49, %v1195_v48 }
 0x2a7   :  { %v964_v58 = vadd.f32 %v1265_v57, %v894_v54 }
 0x2a9   :  { %v968_v63 = vmul.f32 0.001953125, %v964_v58 }
 0x2ab   :  { %v970_v1 = vsub.f32 %v968_v63, %v969_v60 }
 0x2ad   :  { %v972_v2 = vadd.f32 1e-05, %v970_v1 }
 0x2af   :  { %1295 = vrsqrt.f32 %v972_v2 }
 0x2bc   :  { %v1296_v11 = vpop.eup %1295 }
 0x2bd   :  { %v974_v12 = vmul.f32 %v1296_v11, %v971_v9 }
 0x2bf   :  { %983 = vperm.xlu1 %1277, %v974_v12   ;;  %v975_v14 = vmul.f32 %v974_v12, %v967_v51 }
 0x2c1   :  { %977 = vrot.lane.b32.xlu0 %v975_v14, %s1307_s16 }
 0x333   :  { %v978_v18 = vpop.permute.xlu0 %977 }
 0x334   :  { %v980_v20 = vsub.f32 %v971_v9, %v978_v18 }
 0x336   :  { %994 = vperm.xlu0 %1278, %v980_v20  }
 0x33a   :  { %v984_v21 = vpop.permute.xlu1 %983 }
 0x33b   :  { %v986_v22 = vmul.f32 %v984_v21, %v1996_v24  ;;  %v987_v25 = vmul.f32 %v984_v21, %v1998_v19  ;;  %v988_v27 = vmul.f32 %v984_v21, %v2189_v61  ;;  %v989_v28 = vmul.f32 %v984_v21, %v2191_v62 }
 0x33c   :  { %v990_v29 = vmul.f32 %v984_v21, %v2225_v3  ;;  %v991_v31 = vmul.f32 %v984_v21, %v2231_v38 }
 0x3b1   :  { %v995_v4 = vpop.permute.xlu0 %994 }
 0x3b2   :  { %v997_v30 = vadd.f32 %v995_v4, %v986_v22  ;;  %v998_v34 = vadd.f32 %v995_v4, %v987_v25  ;;  %v999_v36 = vadd.f32 %v995_v4, %v988_v27  ;;  %v1000_v56 = vadd.f32 %v995_v4, %v989_v28 }
 0x3b3   :  { %v1001_v37 = vadd.f32 %v995_v4, %v990_v29  ;;  %v1002_v39 = vadd.f32 %v995_v4, %v991_v31 }
 0x3b4   :  { %vm1003_vm9 = vcmp.ge.f32.partialorder %v997_v30, 0.0  ;;  %vm1004_vm10 = vcmp.ge.f32.partialorder %v998_v34, 0.0  ;;  %vm1005_vm11 = vcmp.ge.f32.partialorder %v999_v36, 0.0  ;;  %vm1006_vm12 = vcmp.ge.f32.partialorder %v1000_v56, 0.0 }
 0x3b5   :  { %vm1007_vm13 = vcmp.ge.f32.partialorder %v1001_v37, 0.0  ;;  %vm1008_vm14 = vcmp.ge.f32.partialorder %v1002_v39, 0.0  ;;  %v1009_v61 = vmul.f32 0.1, %v997_v30  ;;  %v1010_v19 = vmul.f32 0.1, %v998_v34 }
 0x3b6   :  { %v1011_v62 = vmul.f32 0.1, %v999_v36  ;;  %v1012_v24 = vmul.f32 0.1, %v1000_v56  ;;  %v1013_v3 = vmul.f32 0.1, %v1001_v37 }
 0x3b7   :  { %v1014_v42 = vmul.f32 0.1, %v1002_v39  ;;  %v1015_v38 = vsel %vm1003_vm9, %v997_v30, %v1009_v61  ;;  %v1016_v44 = vsel %vm1004_vm10, %v998_v34, %v1010_v19 }
 0x3b8   :  { %v1017_v45 = vsel %vm1005_vm11, %v999_v36, %v1011_v62  ;;  %v1018_v47 = vsel %vm1006_vm12, %v1000_v56, %v1012_v24  ;;  %v1019_v50 = vsel %vm1007_vm13, %v1001_v37, %v1013_v3  ;;  %1021 = vst [vmem:[%s2338_s4] sm:$0xff] %v1015_v38  ;;  %1022 = vst [vmem:[%s2338_s4 + $0x8] sm:$0xff] %v1016_v44 }
 0x3b9   :  { %v1020_v52 = vsel %vm1008_vm14, %v1002_v39, %v1014_v42  ;;  %1023 = vst [vmem:[%s2338_s4 + $0x10] sm:$0xff] %v1017_v45  ;;  %1053 = vst [vmem:[%s2338_s4 + $0x18] sm:$0xff] %v1018_v47 }
 0x3ba   :  { %1054 = vst [vmem:[%s2338_s4 + $0x20] sm:$0xff] %v1019_v50  ;;  %1055 = vst [vmem:[%s2338_s4 + $0x28] sm:$0xff] %v1020_v52 }

</bundles_post_ra>
